<compile_context>
chip_gen: v5e
topology: v5e:2x2
jax: 0.10.0
libtpu: 0.0.40
codegen_flags: <defaults>
</compile_context>

<pallas_src>
import functools

import jax
import jax.numpy as jnp
from jax.experimental import pallas as pl
from jax.experimental.pallas import tpu as pltpu

SUBLANE = 8  # TPU sublane width (second-to-last dim of a vreg)


def _round_up(n: int, m: int) -> int:
    return ((n + m - 1) // m) * m


def qnetwork_kernel(x_ref, w1_ref, b1_ref, w2_ref, b2_ref, out_ref):
    # fc1: (TB, obs) @ (obs, H) + (1, H), ReLU.  Accumulate in f32.
    h = jnp.dot(x_ref[...], w1_ref[...], preferred_element_type=jnp.float32)
    h = jnp.maximum(h + b1_ref[...], 0.0)
    # fc2: (TB, H) @ (H, A) + (1, A).  Cast h to the weight dtype so the bf16
    # MXU path is used when params are bf16; accumulation stays f32.
    o = jnp.dot(h.astype(w2_ref.dtype), w2_ref[...],
                preferred_element_type=jnp.float32)
    out_ref[...] = (o + b2_ref[...]).astype(out_ref.dtype)


@functools.partial(jax.jit, static_argnames=("block_b",))
def qnetwork_forward(x, w1, b1, w2, b2, *, block_b: int = 1024):
    """relu(x @ w1 + b1) @ w2 + b2.

    x : (B, obs) float.        w1: (obs, H), b1: (1, H),
    w2: (H, A),  b2: (1, A).   Returns (B, A) float32.

    Compute dtype follows the weight dtype (cast params with prepare_params()
    for the bf16 fast path); accumulation is always f32.
    """
    B, obs = x.shape
    H = w1.shape[1]
    A = w2.shape[1]

    # Batch tile: multiple of 8 always; single tile for small batches,
    # block_b-row tiles (=> grid >= 2, feeds both v7x TCs) for large ones.
    block_b = max(SUBLANE, (block_b // SUBLANE) * SUBLANE)
    tb = _round_up(B, SUBLANE) if B <= block_b else block_b
    B_pad = _round_up(B, tb)

    # Only batch-row padding remains (zero rows are sliced off at the end);
    # no lane padding of x, w2, b2 — their last dims ride as full-array dims.
    if B_pad != B:
        x = jnp.pad(x, ((0, B_pad - B), (0, 0)))

    # Match the (pre-cast) weight dtype; cheap, halves x DMA bytes for bf16.
    x = x.astype(w1.dtype)

    itemsize = jnp.dtype(w1.dtype).itemsize
    cost = pl.CostEstimate(
        flops=2 * B_pad * obs * H + 2 * B_pad * H * A,
        transcendentals=0,
        bytes_accessed=(B_pad * obs * itemsize              # x
                        + obs * H * itemsize + 4 * H        # w1, b1 (f32)
                        + H * A * itemsize + 4 * A          # w2, b2 (f32)
                        + B_pad * A * 4))                   # out (f32)

    out = pl.pallas_call(
        qnetwork_kernel,
        out_shape=jax.ShapeDtypeStruct((B_pad, A), jnp.float32),
        grid=(B_pad // tb,),
        in_specs=[
            # Activations stream one (tb, obs) tile per grid step.
            # (pipeline_mode=pl.Buffered(3) is a possible sweep once tb grows.)
            pl.BlockSpec((tb, obs), lambda i: (i, 0)),
            # Weights / biases: same block every step -> VMEM-resident.
            pl.BlockSpec((obs, H), lambda i: (0, 0)),
            pl.BlockSpec((1, H), lambda i: (0, 0)),
            pl.BlockSpec((H, A), lambda i: (0, 0)),
            pl.BlockSpec((1, A), lambda i: (0, 0)),
        ],
        out_specs=pl.BlockSpec((tb, A), lambda i: (i, 0)),
        compiler_params=pltpu.CompilerParams(
            dimension_semantics=("parallel",)),  # shards batch over v7x's 2 TCs
        cost_estimate=cost,
    )(x, w1, b1, w2, b2)

    return out[:B, :]


def prepare_params(w1, b1, w2, b2, compute_dtype=jnp.bfloat16):
    """One-time parameter prep (hoisted out of the jitted forward).

    Weights are cast to the compute dtype (bf16 halves DMA bytes and uses the
    native bf16 MXU path); biases stay f32 since the bias-add happens on the
    f32 accumulator.
    """
    return (w1.astype(compute_dtype), b1.astype(jnp.float32),
            w2.astype(compute_dtype), b2.astype(jnp.float32))


def init_params(key, obs_size, hidden, action_size):
    """Deterministic init mimicking torch.nn.Linear defaults (U[-1/sqrt(fan_in), ...])."""
    k1, k2, k3, k4 = jax.random.split(key, 4)
    bound1 = 1.0 / jnp.sqrt(obs_size)
    bound2 = 1.0 / jnp.sqrt(hidden)
    w1 = jax.random.uniform(k1, (obs_size, hidden), jnp.float32, -bound1, bound1)
    b1 = jax.random.uniform(k2, (1, hidden), jnp.float32, -bound1, bound1)
    w2 = jax.random.uniform(k3, (hidden, action_size), jnp.float32, -bound2, bound2)
    b2 = jax.random.uniform(k4, (1, action_size), jnp.float32, -bound2, bound2)
    return w1, b1, w2, b2


if __name__ == "__main__":
    # LunarLander-v2: obs_size = 8, action_size = 4; batch_size = 16 (Params).
    batch, obs_size, hidden, action_size = 16, 8, 256, 4

    key = jax.random.PRNGKey(0)
    kx, kp, kb = jax.random.split(key, 3)
    x = jax.random.normal(kx, (batch, obs_size), jnp.float32)
    w1, b1, w2, b2 = init_params(kp, obs_size, hidden, action_size)
    ref = jnp.maximum(x @ w1 + b1, 0.0) @ w2 + b2

    # 1) f32 path (exact semantics check, tight tolerance).
    out = jax.block_until_ready(qnetwork_forward(x, w1, b1, w2, b2))
    assert out.shape == (batch, action_size)
    assert jnp.allclose(out, ref, atol=1e-5, rtol=1e-5)

    # 2) bf16 fast path (params pre-cast once; f32 accumulation) — loosened
    #    tolerance because inputs lose mantissa bits.
    w1b, b1b, w2b, b2b = prepare_params(w1, b1, w2, b2)
    outb = jax.block_until_ready(qnetwork_forward(x, w1b, b1b, w2b, b2b))
    assert outb.shape == (batch, action_size)
    assert jnp.allclose(outb, ref, atol=5e-2, rtol=5e-2)

    # 3) Replay-sized batch (400 rows -> one 400-row tile, no 28% tile waste).
    xr = jax.random.normal(kb, (400, obs_size), jnp.float32)
    outr = jax.block_until_ready(qnetwork_forward(xr, w1, b1, w2, b2))
    refr = jnp.maximum(xr @ w1 + b1, 0.0) @ w2 + b2
    assert outr.shape == (400, action_size)
    assert jnp.allclose(outr, refr, atol=1e-5, rtol=1e-5)

    # 4) Streamed batch larger than the tile (exercises batch padding, the
    #    multi-step grid, and weight residency across grid iterations).
    xs = jax.random.normal(kb, (2056, obs_size), jnp.float32)
    outs = jax.block_until_ready(
        qnetwork_forward(xs, w1, b1, w2, b2, block_b=256))
    refs = jnp.maximum(xs @ w1 + b1, 0.0) @ w2 + b2
    assert outs.shape == (2056, action_size)
    assert jnp.allclose(outs, refs, atol=1e-5, rtol=1e-5)

    print("KERNEL_OK")
</pallas_src>

<mosaic_0001>
module attributes {stable_mosaic.version = 11 : i64} {
  func.func @qnetwork_kernel(%arg0: i32, %arg1: memref<16x8xf32, #tpu.memory_space<vmem>>, %arg2: memref<8x256xf32, #tpu.memory_space<vmem>>, %arg3: memref<1x256xf32, #tpu.memory_space<vmem>>, %arg4: memref<256x4xf32, #tpu.memory_space<vmem>>, %arg5: memref<1x4xf32, #tpu.memory_space<vmem>>, %arg6: memref<16x4xf32, #tpu.memory_space<vmem>>) attributes {dimension_semantics = [#tpu.dimension_semantics<parallel>], iteration_bounds = array<i64: 1>, scalar_prefetch = 0 : i64, scratch_operands = 0 : i64, tpu.core_type = #tpu.core_type<tc>, window_params = [{transform_indices = @transform_0, window_bounds = array<i64: 16, 8>}, {pipeline_mode = #tpu.pipeline_mode<synchronous>, transform_indices = @transform_1, window_bounds = array<i64: 8, 256>}, {pipeline_mode = #tpu.pipeline_mode<synchronous>, transform_indices = @transform_2, window_bounds = array<i64: 1, 256>}, {pipeline_mode = #tpu.pipeline_mode<synchronous>, transform_indices = @transform_3, window_bounds = array<i64: 256, 4>}, {pipeline_mode = #tpu.pipeline_mode<synchronous>, transform_indices = @transform_4, window_bounds = array<i64: 1, 4>}, {transform_indices = @transform_5, window_bounds = array<i64: 16, 4>}]} {
    %c0 = arith.constant 0 : index
    %c0_0 = arith.constant 0 : index
    %0 = vector.load %arg1[%c0, %c0_0] : memref<16x8xf32, #tpu.memory_space<vmem>>, vector<16x8xf32>
    %c0_1 = arith.constant 0 : index
    %c0_2 = arith.constant 0 : index
    %1 = vector.load %arg2[%c0_1, %c0_2] : memref<8x256xf32, #tpu.memory_space<vmem>>, vector<8x256xf32>
    %cst = arith.constant dense<0.000000e+00> : vector<16x256xf32>
    %2 = tpu.matmul %0, %1, %cst {dimension_numbers = #tpu.dot_dimension_numbers<[1], [0], [0], [1], [0, 0, 1, 1], [], []>} : vector<16x8xf32>, vector<8x256xf32>, vector<16x256xf32> -> vector<16x256xf32>
    %c0_3 = arith.constant 0 : index
    %c0_4 = arith.constant 0 : index
    %3 = vector.load %arg3[%c0_3, %c0_4] : memref<1x256xf32, #tpu.memory_space<vmem>>, vector<1x256xf32>
    %4 = vector.broadcast %3 : vector<1x256xf32> to vector<16x256xf32>
    %5 = arith.addf %2, %4 : vector<16x256xf32>
    %cst_5 = arith.constant 0.000000e+00 : f32
    %6 = vector.broadcast %cst_5 : f32 to vector<16x256xf32>
    %7 = arith.maximumf %5, %6 : vector<16x256xf32>
    %c0_6 = arith.constant 0 : index
    %c0_7 = arith.constant 0 : index
    %8 = vector.load %arg4[%c0_6, %c0_7] : memref<256x4xf32, #tpu.memory_space<vmem>>, vector<256x4xf32>
    %cst_8 = arith.constant dense<0.000000e+00> : vector<16x4xf32>
    %9 = tpu.matmul %7, %8, %cst_8 {dimension_numbers = #tpu.dot_dimension_numbers<[1], [0], [0], [1], [0, 0, 1, 1], [], []>} : vector<16x256xf32>, vector<256x4xf32>, vector<16x4xf32> -> vector<16x4xf32>
    %c0_9 = arith.constant 0 : index
    %c0_10 = arith.constant 0 : index
    %10 = vector.load %arg5[%c0_9, %c0_10] : memref<1x4xf32, #tpu.memory_space<vmem>>, vector<1x4xf32>
    %11 = vector.broadcast %10 : vector<1x4xf32> to vector<16x4xf32>
    %12 = arith.addf %9, %11 : vector<16x4xf32>
    %c0_11 = arith.constant 0 : index
    %c0_12 = arith.constant 0 : index
    %13 = vector.load %arg6[%c0_11, %c0_12] : memref<16x4xf32, #tpu.memory_space<vmem>>, vector<16x4xf32>
    tpu.vector_store %arg6[%c0_11, %c0_12], %12 {strides = array<i32>} : memref<16x4xf32, #tpu.memory_space<vmem>>, vector<16x4xf32>,
    return
  }
  func.func @transform_0(%arg0: i32) -> (i32, i32) {
    %c0_i32 = arith.constant 0 : i32
    %c0_i32_0 = arith.constant 0 : i32
    return %arg0, %c0_i32 : i32, i32
  }
  func.func @transform_1(%arg0: i32) -> (i32, i32) {
    %c0_i32 = arith.constant 0 : i32
    %c0_i32_0 = arith.constant 0 : i32
    %c0_i32_1 = arith.constant 0 : i32
    return %c0_i32, %c0_i32_0 : i32, i32
  }
  func.func @transform_2(%arg0: i32) -> (i32, i32) {
    %c0_i32 = arith.constant 0 : i32
    %c0_i32_0 = arith.constant 0 : i32
    %c0_i32_1 = arith.constant 0 : i32
    return %c0_i32, %c0_i32_0 : i32, i32
  }
  func.func @transform_3(%arg0: i32) -> (i32, i32) {
    %c0_i32 = arith.constant 0 : i32
    %c0_i32_0 = arith.constant 0 : i32
    %c0_i32_1 = arith.constant 0 : i32
    return %c0_i32, %c0_i32_0 : i32, i32
  }
  func.func @transform_4(%arg0: i32) -> (i32, i32) {
    %c0_i32 = arith.constant 0 : i32
    %c0_i32_0 = arith.constant 0 : i32
    %c0_i32_1 = arith.constant 0 : i32
    return %c0_i32, %c0_i32_0 : i32, i32
  }
  func.func @transform_5(%arg0: i32) -> (i32, i32) {
    %c0_i32 = arith.constant 0 : i32
    %c0_i32_0 = arith.constant 0 : i32
    return %arg0, %c0_i32 : i32, i32
  }
}

</mosaic_0001>

<bundles_post_ra>
// kernel: qnetwork_forward.1
= control target key start
LH: loop header
LB: loop body
LE: loop exit
PB: predicated region body
PF: predicated region fallthrough
CT: control target
= control target key end

     0   :  { %vm30_vm0 = vcmask 64512   ;;  %vm169_vm1 = vcmask 31744   ;;  %s367_s1 = inlined_call_operand.vmem [shape: f32[8,256], index: 1, kind: input, shape index: {}]   ;;  %s368_s0 = inlined_call_operand.vmem [shape: f32[16,8], index: 0, kind: input, shape index: {}]   ;;  %s369_s3 = inlined_call_operand.vmem [shape: f32[256,4], index: 3, kind: input, shape index: {}]   ;;  %s370_s4 = inlined_call_operand.vmem [shape: f32[1,4], index: 4, kind: input, shape index: {}]   ;;  %s371_s2 = inlined_call_operand.vmem [shape: f32[1,256], index: 2, kind: input, shape index: {}]   ;;  %s372_s5 = inlined_call_operand.vmem [shape: f32[16,4], index: 5, kind: output, shape index: {}]  }
   0x1   :  { %v22_v0 = vld [vmem:[%s367_s1] sm:$0xff]  ;;  %v23_v2 = vld [vmem:[%s367_s1 + $0x8] sm:$0xff]  ;;  %v102_v3 = vld [vmem:[%s369_s3 + $0x78] sm:$0xff] }
   0x2   :  { %v20_v1 = vld [vmem:[%s368_s0] sm:$0xff]  ;;  %52 = vmatpush.msra.mxu0 %v22_v0  ;;  %75 = vmatpush.msra.mxu1 %v23_v2  ;;  %v101_v4 = vld [vmem:[%s369_s3 + $0x70] sm:$0xff]  ;;  %v118_v5 = vld [vmem:[%s369_s3 + $0xf8] sm:$0xff] }
   0x3   :  { %176 = vmatmul.msk.f32.vlgmr.msra.gmra.mxu0 %vm30_vm0, %v20_v1  ;;  %178 = vmatmul.msk.f32.vlgmr.msra.gmra.mxu1 %vm30_vm0, %v20_v1  ;;  %v117_v6 = vld [vmem:[%s369_s3 + $0xf0] sm:$0xff]  ;;  %v100_v7 = vld [vmem:[%s369_s3 + $0x68] sm:$0xff]  ;;  %v99_v9 = vld [vmem:[%s369_s3 + $0x60] sm:$0xff] }
   0x4   :  { %123 = vmatpush.msrb.mxu0 %v102_v3  ;;  %146 = vmatpush.msrb.mxu1 %v118_v5  ;;  %v116_v8 = vld [vmem:[%s369_s3 + $0xe8] sm:$0xff]  ;;  %v115_v10 = vld [vmem:[%s369_s3 + $0xe0] sm:$0xff]  ;;  %v98_v12 = vld [vmem:[%s369_s3 + $0x58] sm:$0xff] }
   0x5   :  { %180 = vmatpush.msra.mxu2 %v102_v3  ;;  %196 = vmatpush.msra.mxu3 %v118_v5  ;;  %v21_v11 = vld [vmem:[%s368_s0 + $0x8] sm:$0xff]  ;;  %v114_v13 = vld [vmem:[%s369_s3 + $0xd8] sm:$0xff]  ;;  %v97_v14 = vld [vmem:[%s369_s3 + $0x50] sm:$0xff] }
   0x6   :  { %124 = vmatpush.msrb.mxu0 %v101_v4  ;;  %147 = vmatpush.msrb.mxu1 %v117_v6  ;;  %v113_v15 = vld [vmem:[%s369_s3 + $0xd0] sm:$0xff]  ;;  %v96_v16 = vld [vmem:[%s369_s3 + $0x48] sm:$0xff]  ;;  %v95_v18 = vld [vmem:[%s369_s3 + $0x40] sm:$0xff] }
   0x7   :  { %181 = vmatpush.msra.mxu2 %v101_v4  ;;  %197 = vmatpush.msra.mxu3 %v117_v6  ;;  %v112_v17 = vld [vmem:[%s369_s3 + $0xc8] sm:$0xff]  ;;  %v111_v19 = vld [vmem:[%s369_s3 + $0xc0] sm:$0xff]  ;;  %v94_v20 = vld [vmem:[%s369_s3 + $0x38] sm:$0xff] }
   0x8   :  { %125 = vmatpush.msrb.mxu0 %v100_v7  ;;  %148 = vmatpush.msrb.mxu1 %v116_v8  ;;  %v110_v21 = vld [vmem:[%s369_s3 + $0xb8] sm:$0xff]  ;;  %v93_v22 = vld [vmem:[%s369_s3 + $0x30] sm:$0xff]  ;;  %v92_v24 = vld [vmem:[%s369_s3 + $0x28] sm:$0xff] }
   0x9   :  { %182 = vmatpush.msra.mxu2 %v100_v7  ;;  %198 = vmatpush.msra.mxu3 %v116_v8  ;;  %v109_v23 = vld [vmem:[%s369_s3 + $0xb0] sm:$0xff]  ;;  %v108_v25 = vld [vmem:[%s369_s3 + $0xa8] sm:$0xff]  ;;  %v91_v26 = vld [vmem:[%s369_s3 + $0x20] sm:$0xff] }
   0xa   :  { %126 = vmatpush.msrb.mxu0 %v99_v9  ;;  %149 = vmatpush.msrb.mxu1 %v115_v10  ;;  %v107_v27 = vld [vmem:[%s369_s3 + $0xa0] sm:$0xff]  ;;  %v90_v28 = vld [vmem:[%s369_s3 + $0x18] sm:$0xff]  ;;  %v89_v29 = vld [vmem:[%s369_s3 + $0x10] sm:$0xff] }
   0xb   :  { %177 = vmatmul.msk.f32.gmra.mxu0 %vm30_vm0, %v21_v11  ;;  %179 = vmatmul.msk.f32.gmra.mxu1 %vm30_vm0, %v21_v11  ;;  %v106_v30 = vld [vmem:[%s369_s3 + $0x98] sm:$0xff]  ;;  %v88_v31 = vld [vmem:[%s369_s3 + $0x8] sm:$0xff]  ;;  %v105_v32 = vld [vmem:[%s369_s3 + $0x90] sm:$0xff] }
   0xc   :  { %127 = vmatpush.msrb.mxu0 %v98_v12  ;;  %150 = vmatpush.msrb.mxu1 %v114_v13  ;;  %v87_v33 = vld [vmem:[%s369_s3] sm:$0xff]  ;;  %v104_v34 = vld [vmem:[%s369_s3 + $0x88] sm:$0xff] }
   0xd   :  { %183 = vmatpush.msra.mxu2 %v99_v9  ;;  %199 = vmatpush.msra.mxu3 %v115_v10  ;;  %v103_v35 = vld [vmem:[%s369_s3 + $0x80] sm:$0xff] }
   0xe   :  { %128 = vmatpush.msrb.mxu0 %v97_v14  ;;  %151 = vmatpush.msrb.mxu1 %v113_v15  ;;  %v24_v36 = vld [vmem:[%s371_s2] sm:$0x3] }
   0xf   :  { %184 = vmatpush.msra.mxu2 %v98_v12  ;;  %200 = vmatpush.msra.mxu3 %v114_v13  ;;  %v26_v37 = vperm.slane %v24_v36, 0  ;;  %v27_v38 = vperm.slane %v24_v36, 1  ;;  %v212_v51 = vld [vmem:[%s370_s4] ss:$0 sm:$0xff] }
  0x10   :  { %129 = vmatpush.msrb.mxu0 %v96_v16  ;;  %152 = vmatpush.msrb.mxu1 %v112_v17 }
  0x11   :  { %185 = vmatpush.msra.mxu2 %v97_v14  ;;  %201 = vmatpush.msra.mxu3 %v113_v15 }
  0x12   :  { %130 = vmatpush.msrb.mxu0 %v95_v18  ;;  %153 = vmatpush.msrb.mxu1 %v111_v19 }
  0x13   :  { %186 = vmatpush.msra.mxu2 %v96_v16  ;;  %202 = vmatpush.msra.mxu3 %v112_v17 }
  0x14   :  { %131 = vmatpush.msrb.mxu0 %v94_v20  ;;  %154 = vmatpush.msrb.mxu1 %v110_v21 }
  0x15   :  { %187 = vmatpush.msra.mxu2 %v95_v18  ;;  %203 = vmatpush.msra.mxu3 %v111_v19 }
  0x16   :  { %132 = vmatpush.msrb.mxu0 %v93_v22  ;;  %155 = vmatpush.msrb.mxu1 %v109_v23 }
  0x17   :  { %188 = vmatpush.msra.mxu2 %v94_v20  ;;  %204 = vmatpush.msra.mxu3 %v110_v21 }
  0x18   :  { %133 = vmatpush.msrb.mxu0 %v92_v24  ;;  %156 = vmatpush.msrb.mxu1 %v108_v25 }
  0x19   :  { %189 = vmatpush.msra.mxu2 %v93_v22  ;;  %205 = vmatpush.msra.mxu3 %v109_v23 }
  0x1a   :  { %134 = vmatpush.msrb.mxu0 %v91_v26  ;;  %157 = vmatpush.msrb.mxu1 %v107_v27 }
  0x1b   :  { %190 = vmatpush.msra.mxu2 %v92_v24  ;;  %206 = vmatpush.msra.mxu3 %v108_v25 }
  0x1c   :  { %135 = vmatpush.msrb.mxu0 %v90_v28  ;;  %158 = vmatpush.msrb.mxu1 %v106_v30 }
  0x1d   :  { %191 = vmatpush.msra.mxu2 %v91_v26  ;;  %207 = vmatpush.msra.mxu3 %v107_v27 }
  0x1e   :  { %136 = vmatpush.msrb.mxu0 %v89_v29  ;;  %159 = vmatpush.msrb.mxu1 %v105_v32 }
  0x1f   :  { %192 = vmatpush.msra.mxu2 %v90_v28  ;;  %208 = vmatpush.msra.mxu3 %v106_v30 }
  0x20   :  { %137 = vmatpush.msrb.mxu0 %v88_v31  ;;  %160 = vmatpush.msrb.mxu1 %v104_v34 }
  0x21   :  { %193 = vmatpush.msra.mxu2 %v89_v29  ;;  %209 = vmatpush.msra.mxu3 %v105_v32 }
  0x22   :  { %138 = vmatpush.msrb.mxu0 %v87_v33  ;;  %161 = vmatpush.msrb.mxu1 %v103_v35 }
  0x23   :  { %194 = vmatpush.msra.mxu2 %v88_v31  ;;  %210 = vmatpush.msra.mxu3 %v104_v34 }
  0x25   :  { %195 = vmatpush.msra.mxu2 %v87_v33  ;;  %211 = vmatpush.msra.mxu3 %v103_v35 }
  0x80   :  { %v54_v39 = vpop.f32.mrf.mxu0  ;;  %v77_v40 = vpop.f32.mrf.mxu1 }
  0x81   :  { %v55_v41 = vadd.f32 %v54_v39, %v26_v37  ;;  %v78_v42 = vadd.f32 %v77_v40, %v27_v38 }
  0x83   :  { %v83_v43 = vmax.f32 %v55_v41, 0.0  ;;  %v84_v44 = vmax.f32 %v78_v42, 0.0 }
  0x85   :  { %139 = vmatmul.f32.vlgmr.msrb.gmra.mxu0 %v83_v43  ;;  %162 = vmatmul.f32.vlgmr.msrb.gmra.mxu1 %v84_v44 }
  0x88   :  { %v57_v45 = vpop.f32.mrf.mxu0  ;;  %v80_v46 = vpop.f32.mrf.mxu1 }
  0x89   :  { %v58_v47 = vadd.f32 %v57_v45, %v26_v37  ;;  %v81_v48 = vadd.f32 %v80_v46, %v27_v38 }
  0x8b   :  { %v85_v49 = vmax.f32 %v58_v47, 0.0  ;;  %v86_v50 = vmax.f32 %v81_v48, 0.0 }
  0x8d   :  { %142 = vmatmul.f32.vlgmr.msra.gmra.mxu2 %v85_v49  ;;  %165 = vmatmul.f32.vlgmr.msra.gmra.mxu3 %v86_v50 }
 0x102   :  { %v140_v52 = vpop.f32.mrf.mxu0  ;;  %v163_v53 = vpop.f32.mrf.mxu1 }
 0x103   :  { %v141_v54 = vadd.f32 %v212_v51, %v140_v52 }
 0x105   :  { %v164_v55 = vadd.f32 %v163_v53, %v141_v54 }
 0x107   :  { %170 = vst.msk [vmem:[%s372_s5] sm:$0xff] %vm169_vm1, %v164_v55 }
 0x110   :  { %v143_v56 = vpop.f32.mrf.mxu2  ;;  %v166_v57 = vpop.f32.mrf.mxu3 }
 0x111   :  { %v144_v58 = vadd.f32 %v212_v51, %v143_v56 }
 0x113   :  { %v167_v59 = vadd.f32 %v166_v57, %v144_v58 }
 0x115   :  { %171 = vst.msk [vmem:[%s372_s5 + $0x8] sm:$0xff] %vm169_vm1, %v167_v59 }

</bundles_post_ra>
